<compile_context>
chip_gen: v7x
topology: tpu7x:2x2x1
jax: 0.10.0
libtpu: 0.0.40
codegen_flags: <defaults>
</compile_context>

<pallas_src>
import jax
import jax.numpy as jnp
from jax.experimental import pallas as pl
from jax.experimental.pallas import tpu as pltpu

NEG_SLOPE = 0.01  # nn.LeakyReLU default
LANE = 128
SUBLANE = 8


def _round_up(n, m):
    return ((n + m - 1) // m) * m


def _leaky_relu(v):
    # Equivalent to where(v>=0, v, 0.01*v) for all finite v; single vmax.
    return jnp.maximum(v, NEG_SLOPE * v)


def dqn_kernel(x_ref,
               w1_ref, b1_ref,
               w2_ref, b2_ref,
               w3_ref, b3_ref,
               w4_ref, b4_ref,
               out_ref):
    x = x_ref[...]

    # Layer 1: Linear + LeakyReLU (+ Dropout == identity at inference).
    # w1/b1 are f32 (tiny); layer-1 input keeps full precision.
    h = jnp.dot(x.astype(w1_ref.dtype), w1_ref[...],
                preferred_element_type=jnp.float32) + b1_ref[...]
    h = _leaky_relu(h)

    # Layer 2: Linear + LeakyReLU (+ Dropout == identity at inference).
    # Only the matmul operands are cast to the weight dtype (bf16 hot path);
    # bias add / activation stay f32.
    h = jnp.dot(h.astype(w2_ref.dtype), w2_ref[...],
                preferred_element_type=jnp.float32) + b2_ref[...]
    h = _leaky_relu(h)

    # Layer 3: Linear + LeakyReLU.
    h = jnp.dot(h.astype(w3_ref.dtype), w3_ref[...],
                preferred_element_type=jnp.float32) + b3_ref[...]
    h = _leaky_relu(h)

    # Output layer: Linear (no activation); narrow (action_space) output ->
    # minimal HBM writeback.
    out_ref[...] = (jnp.dot(h.astype(w4_ref.dtype), w4_ref[...],
                            preferred_element_type=jnp.float32)
                    + b4_ref[...]).astype(out_ref.dtype)


def _pad2d(a, rows, cols):
    return jnp.pad(a, ((0, rows - a.shape[0]), (0, cols - a.shape[1])))


def prepare_params(params):
    """Zero-pad the hidden width up to a multiple of 128 so every internal
    matmul is lane-dense.  Zero padding is exact: padded hidden units get
    pre-activation 0 -> LeakyReLU(0) = 0 -> contribute nothing downstream.
    The output width (action_space) is intentionally NOT padded: the final
    store is tiny and narrow beats a 21x-padded writeback."""
    obs, hidden = params["w1"].shape
    act = params["w4"].shape[1]
    h_pad = _round_up(hidden, LANE)
    return {
        "w1": _pad2d(params["w1"], obs, h_pad),
        "b1": _pad2d(params["b1"], 1, h_pad),
        "w2": _pad2d(params["w2"], h_pad, h_pad),
        "b2": _pad2d(params["b2"], 1, h_pad),
        "w3": _pad2d(params["w3"], h_pad, h_pad),
        "b3": _pad2d(params["b3"], 1, h_pad),
        "w4": _pad2d(params["w4"], h_pad, act),   # rows only
        "b4": params["b4"],
    }


def _pick_batch_tile(B):
    """Largest sublane-aligned tile (<= 256 rows) that still yields a grid of
    at least 2 steps, so both v7x TensorCores get work; tiny batches use a
    single sublane-aligned tile."""
    if B >= 2 * SUBLANE:
        return min(256, _round_up((B + 1) // 2, SUBLANE))
    return _round_up(max(B, 1), SUBLANE)


def dqn_forward(x, padded_params, action_space):
    """x: (B, obs) float32; padded_params: output of prepare_params."""
    B, obs = x.shape
    a_out = padded_params["w4"].shape[1]
    assert a_out == action_space

    TB = _pick_batch_tile(B)
    B_pad = _round_up(B, TB)
    if B_pad != B:
        x = jnp.pad(x, ((0, B_pad - B), (0, 0)))

    weights = (padded_params["w1"], padded_params["b1"],
               padded_params["w2"], padded_params["b2"],
               padded_params["w3"], padded_params["b3"],
               padded_params["w4"], padded_params["b4"])

    in_specs = [pl.BlockSpec((TB, obs), lambda i: (i, 0))]
    # Constant block index -> weights/biases stay VMEM-resident across the
    # whole batch grid instead of being re-DMA'd per step.
    in_specs += [pl.BlockSpec(p.shape, lambda i: (0, 0)) for p in weights]

    out = pl.pallas_call(
        dqn_kernel,
        out_shape=jax.ShapeDtypeStruct((B_pad, a_out), jnp.float32),
        grid=(B_pad // TB,),
        in_specs=in_specs,
        out_specs=pl.BlockSpec((TB, a_out), lambda i: (i, 0)),
        compiler_params=pltpu.CompilerParams(
            dimension_semantics=("parallel",)),  # shard batch across TCs (v7x)
    )(x, *weights)

    return out[:B] if B_pad != B else out


def init_dqn_params(key, observation_space, action_space, neurons_per_layer,
                    hidden_dtype=jnp.bfloat16):
    """Deterministic synthetic init.  PyTorch Linear weight is (out, in); we
    store the transpose (in, out) so the kernel does x @ W + b.
    w1 and all biases stay float32; the three large matmul weights use
    `hidden_dtype` (bf16 by default -> native MXU path, half the weight DMA)."""
    dims = [(observation_space, neurons_per_layer),
            (neurons_per_layer, neurons_per_layer),
            (neurons_per_layer, neurons_per_layer),
            (neurons_per_layer, action_space)]
    params = {}
    for i, (din, dout) in enumerate(dims, start=1):
        key, kw, kb = jax.random.split(key, 3)
        bound = 1.0 / jnp.sqrt(jnp.float32(din))  # PyTorch default init range
        w_dtype = jnp.float32 if i == 1 else hidden_dtype
        params[f"w{i}"] = jax.random.uniform(
            kw, (din, dout), jnp.float32, minval=-bound, maxval=bound
        ).astype(w_dtype)
        # bias kept 2D (1, dout) f32 so it adds straight into the f32 accum
        params[f"b{i}"] = jax.random.uniform(
            kb, (1, dout), jnp.float32, minval=-bound, maxval=bound)
    return params


def dqn_forward_ref(x, params):
    """Pure-JAX reference (unpadded params), mirroring the kernel's dtype
    handling (matmul operands in the weight dtype, f32 accumulation)."""
    def lin(h, w, b):
        return jnp.dot(h.astype(w.dtype), w,
                       preferred_element_type=jnp.float32) + b.astype(jnp.float32)
    h = _leaky_relu(lin(x, params["w1"], params["b1"]))
    h = _leaky_relu(lin(h, params["w2"], params["b2"]))
    h = _leaky_relu(lin(h, params["w3"], params["b3"]))
    return lin(h, params["w4"], params["b4"])


if __name__ == "__main__":
    observation_space = 4
    action_space = 6
    neurons_per_layer = 32

    key = jax.random.PRNGKey(0)
    key, kx_small, kx_big = jax.random.split(key, 3)

    # Full-f32 path, tiny ragged batch (exercises batch padding + 1-step grid).
    params_f32 = init_dqn_params(key, observation_space, action_space,
                                 neurons_per_layer, hidden_dtype=jnp.float32)
    padded_f32 = prepare_params(params_f32)
    x_small = jax.random.normal(kx_small, (5, observation_space), jnp.float32)
    out_small = jax.block_until_ready(
        dqn_forward(x_small, padded_f32, action_space))
    ref_small = dqn_forward_ref(x_small, params_f32)
    assert out_small.shape == (5, action_space)
    assert jnp.allclose(out_small, ref_small, atol=1e-5, rtol=1e-5), \
        "f32 small-batch mismatch vs reference"

    # bf16 hot path, big batch (TB=256 -> 2 parallel grid steps; this is the
    # throughput-relevant path per the perf review).
    params_bf16 = init_dqn_params(key, observation_space, action_space,
                                  neurons_per_layer, hidden_dtype=jnp.bfloat16)
    padded_bf16 = prepare_params(params_bf16)
    x_big = jax.random.normal(kx_big, (512, observation_space), jnp.float32)
    out_big = jax.block_until_ready(
        dqn_forward(x_big, padded_bf16, action_space))
    ref_big = dqn_forward_ref(x_big, params_bf16)
    assert out_big.shape == (512, action_space)
    assert jnp.allclose(out_big, ref_big, atol=2e-3, rtol=2e-2), \
        "bf16 large-batch mismatch vs reference"

    print("KERNEL_OK")
</pallas_src>

<mosaic_0001>
module attributes {stable_mosaic.version = 11 : i64} {
  func.func @dqn_kernel(%arg0: i32, %arg1: memref<8x4xf32, #tpu.memory_space<vmem>>, %arg2: memref<4x128xf32, #tpu.memory_space<vmem>>, %arg3: memref<1x128xf32, #tpu.memory_space<vmem>>, %arg4: memref<128x128xf32, #tpu.memory_space<vmem>>, %arg5: memref<1x128xf32, #tpu.memory_space<vmem>>, %arg6: memref<128x128xf32, #tpu.memory_space<vmem>>, %arg7: memref<1x128xf32, #tpu.memory_space<vmem>>, %arg8: memref<128x6xf32, #tpu.memory_space<vmem>>, %arg9: memref<1x6xf32, #tpu.memory_space<vmem>>, %arg10: memref<8x6xf32, #tpu.memory_space<vmem>>) attributes {dimension_semantics = [#tpu.dimension_semantics<parallel>], iteration_bounds = array<i64: 1>, scalar_prefetch = 0 : i64, scratch_operands = 0 : i64, tpu.core_type = #tpu.core_type<tc>, window_params = [{transform_indices = @transform_0, window_bounds = array<i64: 8, 4>}, {pipeline_mode = #tpu.pipeline_mode<synchronous>, transform_indices = @transform_1, window_bounds = array<i64: 4, 128>}, {pipeline_mode = #tpu.pipeline_mode<synchronous>, transform_indices = @transform_2, window_bounds = array<i64: 1, 128>}, {pipeline_mode = #tpu.pipeline_mode<synchronous>, transform_indices = @transform_3, window_bounds = array<i64: 128, 128>}, {pipeline_mode = #tpu.pipeline_mode<synchronous>, transform_indices = @transform_4, window_bounds = array<i64: 1, 128>}, {pipeline_mode = #tpu.pipeline_mode<synchronous>, transform_indices = @transform_5, window_bounds = array<i64: 128, 128>}, {pipeline_mode = #tpu.pipeline_mode<synchronous>, transform_indices = @transform_6, window_bounds = array<i64: 1, 128>}, {pipeline_mode = #tpu.pipeline_mode<synchronous>, transform_indices = @transform_7, window_bounds = array<i64: 128, 6>}, {pipeline_mode = #tpu.pipeline_mode<synchronous>, transform_indices = @transform_8, window_bounds = array<i64: 1, 6>}, {transform_indices = @transform_9, window_bounds = array<i64: 8, 6>}]} {
    %c0 = arith.constant 0 : index
    %c0_0 = arith.constant 0 : index
    %0 = vector.load %arg1[%c0, %c0_0] : memref<8x4xf32, #tpu.memory_space<vmem>>, vector<8x4xf32>
    %c0_1 = arith.constant 0 : index
    %c0_2 = arith.constant 0 : index
    %1 = vector.load %arg2[%c0_1, %c0_2] : memref<4x128xf32, #tpu.memory_space<vmem>>, vector<4x128xf32>
    %cst = arith.constant dense<0.000000e+00> : vector<8x128xf32>
    %2 = tpu.matmul %0, %1, %cst {dimension_numbers = #tpu.dot_dimension_numbers<[1], [0], [0], [1], [0, 0, 1, 1], [], []>} : vector<8x4xf32>, vector<4x128xf32>, vector<8x128xf32> -> vector<8x128xf32>
    %c0_3 = arith.constant 0 : index
    %c0_4 = arith.constant 0 : index
    %3 = vector.load %arg3[%c0_3, %c0_4] : memref<1x128xf32, #tpu.memory_space<vmem>>, vector<1x128xf32>
    %4 = vector.broadcast %3 : vector<1x128xf32> to vector<8x128xf32>
    %5 = arith.addf %2, %4 : vector<8x128xf32>
    %cst_5 = arith.constant 0.00999999977 : f32
    %6 = vector.broadcast %cst_5 : f32 to vector<8x128xf32>
    %7 = arith.mulf %6, %5 : vector<8x128xf32>
    %8 = arith.maximumf %5, %7 : vector<8x128xf32>
    %c0_6 = arith.constant 0 : index
    %c0_7 = arith.constant 0 : index
    %9 = vector.load %arg4[%c0_6, %c0_7] : memref<128x128xf32, #tpu.memory_space<vmem>>, vector<128x128xf32>
    %cst_8 = arith.constant dense<0.000000e+00> : vector<8x128xf32>
    %10 = tpu.matmul %8, %9, %cst_8 {dimension_numbers = #tpu.dot_dimension_numbers<[1], [0], [0], [1], [0, 0, 1, 1], [], []>} : vector<8x128xf32>, vector<128x128xf32>, vector<8x128xf32> -> vector<8x128xf32>
    %c0_9 = arith.constant 0 : index
    %c0_10 = arith.constant 0 : index
    %11 = vector.load %arg5[%c0_9, %c0_10] : memref<1x128xf32, #tpu.memory_space<vmem>>, vector<1x128xf32>
    %12 = vector.broadcast %11 : vector<1x128xf32> to vector<8x128xf32>
    %13 = arith.addf %10, %12 : vector<8x128xf32>
    %cst_11 = arith.constant 0.00999999977 : f32
    %14 = vector.broadcast %cst_11 : f32 to vector<8x128xf32>
    %15 = arith.mulf %14, %13 : vector<8x128xf32>
    %16 = arith.maximumf %13, %15 : vector<8x128xf32>
    %c0_12 = arith.constant 0 : index
    %c0_13 = arith.constant 0 : index
    %17 = vector.load %arg6[%c0_12, %c0_13] : memref<128x128xf32, #tpu.memory_space<vmem>>, vector<128x128xf32>
    %cst_14 = arith.constant dense<0.000000e+00> : vector<8x128xf32>
    %18 = tpu.matmul %16, %17, %cst_14 {dimension_numbers = #tpu.dot_dimension_numbers<[1], [0], [0], [1], [0, 0, 1, 1], [], []>} : vector<8x128xf32>, vector<128x128xf32>, vector<8x128xf32> -> vector<8x128xf32>
    %c0_15 = arith.constant 0 : index
    %c0_16 = arith.constant 0 : index
    %19 = vector.load %arg7[%c0_15, %c0_16] : memref<1x128xf32, #tpu.memory_space<vmem>>, vector<1x128xf32>
    %20 = vector.broadcast %19 : vector<1x128xf32> to vector<8x128xf32>
    %21 = arith.addf %18, %20 : vector<8x128xf32>
    %cst_17 = arith.constant 0.00999999977 : f32
    %22 = vector.broadcast %cst_17 : f32 to vector<8x128xf32>
    %23 = arith.mulf %22, %21 : vector<8x128xf32>
    %24 = arith.maximumf %21, %23 : vector<8x128xf32>
    %c0_18 = arith.constant 0 : index
    %c0_19 = arith.constant 0 : index
    %25 = vector.load %arg8[%c0_18, %c0_19] : memref<128x6xf32, #tpu.memory_space<vmem>>, vector<128x6xf32>
    %cst_20 = arith.constant dense<0.000000e+00> : vector<8x6xf32>
    %26 = tpu.matmul %24, %25, %cst_20 {dimension_numbers = #tpu.dot_dimension_numbers<[1], [0], [0], [1], [0, 0, 1, 1], [], []>} : vector<8x128xf32>, vector<128x6xf32>, vector<8x6xf32> -> vector<8x6xf32>
    %c0_21 = arith.constant 0 : index
    %c0_22 = arith.constant 0 : index
    %27 = vector.load %arg9[%c0_21, %c0_22] : memref<1x6xf32, #tpu.memory_space<vmem>>, vector<1x6xf32>
    %28 = vector.broadcast %27 : vector<1x6xf32> to vector<8x6xf32>
    %29 = arith.addf %26, %28 : vector<8x6xf32>
    %c0_23 = arith.constant 0 : index
    %c0_24 = arith.constant 0 : index
    %30 = vector.load %arg10[%c0_23, %c0_24] : memref<8x6xf32, #tpu.memory_space<vmem>>, vector<8x6xf32>
    tpu.vector_store %arg10[%c0_23, %c0_24], %29 {strides = array<i32>} : memref<8x6xf32, #tpu.memory_space<vmem>>, vector<8x6xf32>,
    return
  }
  func.func @transform_0(%arg0: i32) -> (i32, i32) {
    %c0_i32 = arith.constant 0 : i32
    %c0_i32_0 = arith.constant 0 : i32
    return %arg0, %c0_i32 : i32, i32
  }
  func.func @transform_1(%arg0: i32) -> (i32, i32) {
    %c0_i32 = arith.constant 0 : i32
    %c0_i32_0 = arith.constant 0 : i32
    %c0_i32_1 = arith.constant 0 : i32
    return %c0_i32, %c0_i32_0 : i32, i32
  }
  func.func @transform_2(%arg0: i32) -> (i32, i32) {
    %c0_i32 = arith.constant 0 : i32
    %c0_i32_0 = arith.constant 0 : i32
    %c0_i32_1 = arith.constant 0 : i32
    return %c0_i32, %c0_i32_0 : i32, i32
  }
  func.func @transform_3(%arg0: i32) -> (i32, i32) {
    %c0_i32 = arith.constant 0 : i32
    %c0_i32_0 = arith.constant 0 : i32
    %c0_i32_1 = arith.constant 0 : i32
    return %c0_i32, %c0_i32_0 : i32, i32
  }
  func.func @transform_4(%arg0: i32) -> (i32, i32) {
    %c0_i32 = arith.constant 0 : i32
    %c0_i32_0 = arith.constant 0 : i32
    %c0_i32_1 = arith.constant 0 : i32
    return %c0_i32, %c0_i32_0 : i32, i32
  }
  func.func @transform_5(%arg0: i32) -> (i32, i32) {
    %c0_i32 = arith.constant 0 : i32
    %c0_i32_0 = arith.constant 0 : i32
    %c0_i32_1 = arith.constant 0 : i32
    return %c0_i32, %c0_i32_0 : i32, i32
  }
  func.func @transform_6(%arg0: i32) -> (i32, i32) {
    %c0_i32 = arith.constant 0 : i32
    %c0_i32_0 = arith.constant 0 : i32
    %c0_i32_1 = arith.constant 0 : i32
    return %c0_i32, %c0_i32_0 : i32, i32
  }
  func.func @transform_7(%arg0: i32) -> (i32, i32) {
    %c0_i32 = arith.constant 0 : i32
    %c0_i32_0 = arith.constant 0 : i32
    %c0_i32_1 = arith.constant 0 : i32
    return %c0_i32, %c0_i32_0 : i32, i32
  }
  func.func @transform_8(%arg0: i32) -> (i32, i32) {
    %c0_i32 = arith.constant 0 : i32
    %c0_i32_0 = arith.constant 0 : i32
    %c0_i32_1 = arith.constant 0 : i32
    return %c0_i32, %c0_i32_0 : i32, i32
  }
  func.func @transform_9(%arg0: i32) -> (i32, i32) {
    %c0_i32 = arith.constant 0 : i32
    %c0_i32_0 = arith.constant 0 : i32
    return %arg0, %c0_i32 : i32, i32
  }
}

</mosaic_0001>

<bundles_post_ra>
// kernel: tpu_custom_call.1
= control target key start
LH: loop header
LB: loop body
LE: loop exit
PB: predicated region body
PF: predicated region fallthrough
CT: control target
= control target key end

     0   :  { %14 = vsyncpa [#allocation3], 0  ;;  %s960_s0 = inlined_call_operand.vmem [shape: f32[8,4], index: 0, kind: input, shape index: {}]   ;;  %s961_s1 = inlined_call_operand.vmem [shape: f32[4,128], index: 1, kind: input, shape index: {}]   ;;  %s962_s2 = inlined_call_operand.vmem [shape: f32[1,128], index: 2, kind: input, shape index: {}]   ;;  %s963_s3 = inlined_call_operand.vmem [shape: f32[128,128], index: 3, kind: input, shape index: {}]   ;;  %s964_s4 = inlined_call_operand.vmem [shape: f32[1,128], index: 4, kind: input, shape index: {}]   ;;  %s965_s5 = inlined_call_operand.hbm [shape: f32[128,128], index: 5, kind: input, shape index: {}]   ;;  %s966_s6 = inlined_call_operand.vmem [shape: f32[1,128], index: 6, kind: input, shape index: {}]   ;;  %s967_s7 = inlined_call_operand.vmem [shape: f32[128,6], index: 7, kind: input, shape index: {}]   ;;  %s968_s8 = inlined_call_operand.vmem [shape: f32[1,6], index: 8, kind: input, shape index: {}]   ;;  %s969_s9 = inlined_call_operand.hbm [shape: f32[8,6], index: 9, kind: output, shape index: {}]  }
   0x1   :  { %15 = vsyncpa [#allocation4], 0  ;;  %s732_s30 = smov [#allocation2]   ;;  %s684_s13 = scalar_lea.hbm %s965_s5, 2048 }
   0x2   :  { %s31_s10 = sshll.u32 %s732_s30, 4  ;;  %p685_p0 = scmp.ne.s32.totalorder %s965_s5, %s684_s13  ;;  %s32_s10 = int_to_ptr.vmem [resolvable:$true] %s31_s10 }
   0x3   :  { %p688_p1 = scmp.lt.u32.totalorder %s684_s13, %s965_s5 }
   0x5   :  { %p690_p2 = pnand %p688_p1, %p685_p0 }
   0x7   :  { %693 = shalt.err (!%p690_p2)
}
   0x8   :  { %s694_s18 = scalar_lea.vmem %s32_s10, 2048  ;;  %p699_p4 = scmp.lt.s32.totalorder %s32_s10, %s32_s10 }
   0x9   :  { %p695_p3 = scmp.ne.s32.totalorder %s32_s10, %s694_s18  ;;  %p700_p5 = scmp.lt.s32.totalorder %s694_s18, %s694_s18 }
   0xb   :  { %p701_p6 = por %p700_p5, %p699_p4 }
   0xd   :  { %p702_p7 = pnand %p701_p6, %p695_p3 }
   0xf   :  { %705 = shalt.err (!%p702_p7)
}
  0x10   :  { %s733_s19 = smov 128   ;;  %s734_s20 = smov 8  }
  0x11   :  { %37 = dma.hbm_to_vmem [thread:$0]  %s965_s5, 2048, %s32_s10, [#allocation3], %s733_s19, %s733_s19, %s734_s20  }
  0x12   :  { %728 = dma.done.wait [#allocation3], 2048  }
  0x13   :  { %729 = vsyncadd [#allocation3], 4294965248  ;;  %v735_v0 = vmov 0.0   ;;  %vm736_vm0 = vmmov 0   ;;  %v737_v1 = vmov 0.0|0.0   ;;  %vm60_vm1 = vcmask 1043456  }
  0x14   :  { %495 = vmatprep.subr.mxu0 %v735_v0  ;;  %497 = vmatprep.mubr.msk.f32.mxu0 %vm736_vm0, %v735_v0  ;;  %vm56_vm2 = vcmask 31744   ;;  %v48_v2 = vld [vmem:[%s961_s1] sm:$0xf]  ;;  %v137_v5 = vld [vmem:[%s963_s3 + $0x8] sm:$0xff]  ;;  %v138_v6 = vld [vmem:[%s963_s3 + $0x10] sm:$0xff]  ;;  %s738_s22 = smov [#allocation5]  }
  0x15   :  { %605 = vmatprep.subr.bf16.mxu1 %v737_v1  ;;  %532 = vmatprep.mubr.msk.f32.mxu1 %vm736_vm0, %v735_v0  ;;  %v47_v3 = vld [vmem:[%s960_s0] sm:$0xff]  ;;  %v139_v7 = vld [vmem:[%s963_s3 + $0x18] sm:$0xff]  ;;  %v141_v11 = vld [vmem:[%s963_s3 + $0x28] sm:$0xff]  ;;  %s427_s23 = sshll.u32 %s738_s22, 4  ;;  %vm419_vm3 = vcmask 48128   ;;  %s428_s23 = int_to_ptr.vmem [resolvable:$true] %s427_s23 }
  0x16   :  { %v136_v4 = vld [vmem:[%s963_s3] sm:$0xff]  ;;  %496 = vmatpush3.msk.msra.mxu0 %vm60_vm1, %v48_v2  ;;  %v609_v9 = vpack.c.bf16 %v139_v7, %v138_v6  ;;  %v142_v13 = vld [vmem:[%s963_s3 + $0x30] sm:$0xff]  ;;  %v143_v14 = vld [vmem:[%s963_s3 + $0x38] sm:$0xff]  ;;  %p711_p9 = scmp.lt.s32.totalorder %s428_s23, %s428_s23 }
  0x17   :  { %498 = vmatmul.mubr.msk.f32.vlgmr.msra.gmra.mrb[0].mxu0 %vm56_vm2, %v47_v3  ;;  %v606_v8 = vpack.c.bf16 %v137_v5, %v136_v4  ;;  %629 = vmatprep.subr.bf16.mxu0 %v737_v1  ;;  %v140_v10 = vld [vmem:[%s963_s3 + $0x20] sm:$0xff]  ;;  %v615_v15 = vpack.c.bf16 %v143_v14, %v142_v13  ;;  %v145_v17 = vld [vmem:[%s963_s3 + $0x48] sm:$0xff]  ;;  %v146_v19 = vld [vmem:[%s963_s3 + $0x50] sm:$0xff] }
  0x18   :  { %567 = vmatprep.mubr.msk.f32.mxu0 %vm736_vm0, %v735_v0  ;;  %v612_v12 = vpack.c.bf16 %v141_v11, %v140_v10  ;;  %v144_v16 = vld [vmem:[%s963_s3 + $0x40] sm:$0xff]  ;;  %v147_v20 = vld [vmem:[%s963_s3 + $0x58] sm:$0xff]  ;;  %v149_v23 = vld [vmem:[%s963_s3 + $0x68] sm:$0xff] }
  0x19   :  { %607 = vmatpush3.bf16.msra.mxu1 %v606_v8  ;;  %v618_v18 = vpack.c.bf16 %v145_v17, %v144_v16  ;;  %v621_v21 = vpack.c.bf16 %v147_v20, %v146_v19  ;;  %v148_v22 = vld [vmem:[%s963_s3 + $0x60] sm:$0xff]  ;;  %v150_v25 = vld [vmem:[%s963_s3 + $0x70] sm:$0xff]  ;;  %v151_v26 = vld [vmem:[%s963_s3 + $0x78] sm:$0xff] }
  0x1a   :  { %608 = vmatprep.subr.bf16.mxu1 %v737_v1  ;;  %v624_v24 = vpack.c.bf16 %v149_v23, %v148_v22  ;;  %v627_v27 = vpack.c.bf16 %v151_v26, %v150_v25  ;;  %v231_v28 = vld [vmem:[#allocation2] sm:$0xff]  ;;  %v232_v29 = vld [vmem:[#allocation2 + $0x8] sm:$0xff]  ;;  %v233_v30 = vld [vmem:[#allocation2 + $0x10] sm:$0xff] }
  0x1b   :  { %v630_v31 = vpack.c.bf16 %v232_v29, %v231_v28  ;;  %v234_v32 = vld [vmem:[#allocation2 + $0x18] sm:$0xff]  ;;  %v235_v34 = vld [vmem:[#allocation2 + $0x20] sm:$0xff]  ;;  %v236_v35 = vld [vmem:[#allocation2 + $0x28] sm:$0xff] }
  0x1c   :  { %v633_v33 = vpack.c.bf16 %v234_v32, %v233_v30  ;;  %v636_v36 = vpack.c.bf16 %v236_v35, %v235_v34  ;;  %v237_v37 = vld [vmem:[#allocation2 + $0x30] sm:$0xff]  ;;  %v238_v38 = vld [vmem:[#allocation2 + $0x38] sm:$0xff]  ;;  %v239_v40 = vld [vmem:[#allocation2 + $0x40] sm:$0xff] }
  0x1d   :  { %610 = vmatpush3.bf16.msra.mxu1 %v609_v9  ;;  %631 = vmatpush3.bf16.msra.mxu0 %v630_v31  ;;  %v639_v39 = vpack.c.bf16 %v238_v38, %v237_v37  ;;  %v240_v41 = vld [vmem:[#allocation2 + $0x48] sm:$0xff]  ;;  %v241_v43 = vld [vmem:[#allocation2 + $0x50] sm:$0xff]  ;;  %v242_v44 = vld [vmem:[#allocation2 + $0x58] sm:$0xff] }
  0x1e   :  { %611 = vmatprep.subr.bf16.mxu1 %v737_v1  ;;  %632 = vmatprep.subr.bf16.mxu0 %v737_v1  ;;  %v642_v42 = vpack.c.bf16 %v240_v41, %v239_v40  ;;  %v645_v45 = vpack.c.bf16 %v242_v44, %v241_v43  ;;  %v436_v46 = vld [vmem:[%s962_s2] ss:$0 sm:$0xff]  ;;  %v243_v52 = vld [vmem:[#allocation2 + $0x60] sm:$0xff]  ;;  %v244_v53 = vld [vmem:[#allocation2 + $0x68] sm:$0xff] }
  0x1f   :  { %v648_v54 = vpack.c.bf16 %v244_v53, %v243_v52  ;;  %v245_v55 = vld [vmem:[#allocation2 + $0x70] sm:$0xff]  ;;  %v246_v56 = vld [vmem:[#allocation2 + $0x78] sm:$0xff]  ;;  %v327_v59 = vld [vmem:[%s967_s7 + $0x8] sm:$0xff] }
  0x20   :  { %v651_v57 = vpack.c.bf16 %v246_v56, %v245_v55  ;;  %v326_v58 = vld [vmem:[%s967_s7] sm:$0xff]  ;;  %v328_v60 = vld [vmem:[%s967_s7 + $0x10] sm:$0xff]  ;;  %v329_v62 = vld [vmem:[%s967_s7 + $0x18] sm:$0xff] }
  0x21   :  { %613 = vmatpush3.bf16.msra.mxu1 %v612_v12  ;;  %634 = vmatpush3.bf16.msra.mxu0 %v633_v33  ;;  %v654_v61 = vpack.c.bf16 %v327_v59, %v326_v58  ;;  %v657_v63 = vpack.c.bf16 %v329_v62, %v328_v60  ;;  %v331_v2 = vld [vmem:[%s967_s7 + $0x28] sm:$0xff]  ;;  %v332_v4 = vld [vmem:[%s967_s7 + $0x30] sm:$0xff]  ;;  %v333_v5 = vld [vmem:[%s967_s7 + $0x38] sm:$0xff] }
  0x22   :  { %614 = vmatprep.subr.bf16.mxu1 %v737_v1  ;;  %635 = vmatprep.subr.bf16.mxu0 %v737_v1  ;;  %v663_v6 = vpack.c.bf16 %v333_v5, %v332_v4  ;;  %v334_v7 = vld [vmem:[%s967_s7 + $0x40] sm:$0xff]  ;;  %v335_v8 = vld [vmem:[%s967_s7 + $0x48] sm:$0xff]  ;;  %v336_v10 = vld [vmem:[%s967_s7 + $0x50] sm:$0xff] }
  0x23   :  { %v666_v9 = vpack.c.bf16 %v335_v8, %v334_v7  ;;  %v337_v11 = vld [vmem:[%s967_s7 + $0x58] sm:$0xff]  ;;  %v439_v13 = vld [vmem:[%s964_s4] ss:$0 sm:$0xff]  ;;  %v339_v20 = vld [vmem:[%s967_s7 + $0x68] sm:$0xff] }
  0x24   :  { %v669_v12 = vpack.c.bf16 %v337_v11, %v336_v10  ;;  %v338_v19 = vld [vmem:[%s967_s7 + $0x60] sm:$0xff]  ;;  %v340_v22 = vld [vmem:[%s967_s7 + $0x70] sm:$0xff]  ;;  %v341_v23 = vld [vmem:[%s967_s7 + $0x78] sm:$0xff] }
  0x25   :  { %616 = vmatpush3.bf16.msra.mxu1 %v615_v15  ;;  %637 = vmatpush3.bf16.msra.mxu0 %v636_v36  ;;  %v440_v25 = vld [vmem:[%s966_s6] ss:$0 sm:$0xff] }
  0x26   :  { %617 = vmatprep.subr.bf16.mxu1 %v737_v1  ;;  %638 = vmatprep.subr.bf16.mxu0 %v737_v1 }
  0x29   :  { %619 = vmatpush3.bf16.msra.mxu1 %v618_v18  ;;  %640 = vmatpush3.bf16.msra.mxu0 %v639_v39 }
  0x2a   :  { %620 = vmatprep.subr.bf16.mxu1 %v737_v1  ;;  %641 = vmatprep.subr.bf16.mxu0 %v737_v1 }
  0x2d   :  { %622 = vmatpush3.bf16.msra.mxu1 %v621_v21  ;;  %643 = vmatpush3.bf16.msra.mxu0 %v642_v42  ;;  %v672_v21 = vpack.c.bf16 %v339_v20, %v338_v19 }
  0x2e   :  { %623 = vmatprep.subr.bf16.mxu1 %v737_v1  ;;  %644 = vmatprep.subr.bf16.mxu0 %v737_v1 }
  0x31   :  { %625 = vmatpush3.bf16.msra.mxu1 %v624_v24  ;;  %646 = vmatpush3.bf16.msra.mxu0 %v645_v45  ;;  %v675_v24 = vpack.c.bf16 %v341_v23, %v340_v22 }
  0x32   :  { %626 = vmatprep.subr.bf16.mxu1 %v737_v1  ;;  %647 = vmatprep.subr.bf16.mxu0 %v737_v1 }
  0x35   :  { %628 = vmatpush3.bf16.msra.mxu1 %v627_v27  ;;  %649 = vmatpush3.bf16.msra.mxu0 %v648_v54 }
  0x36   :  { %653 = vmatprep.subr.bf16.mxu1 %v737_v1  ;;  %650 = vmatprep.subr.bf16.mxu0 %v737_v1 }
  0x39   :  { %652 = vmatpush3.bf16.msra.mxu0 %v651_v57 }
  0xea   :  { %v130_v47 = vpop.f32.mrb[0].mxu0 }
  0xeb   :  { %v131_v48 = vadd.f32 %v436_v46, %v130_v47  ;;  %v499_v49 = vpop.f32.mrb[1].mxu0 }
  0xed   :  { %v134_v50 = vmul.f32 0.01, %v131_v48 }
  0xef   :  { %v135_v51 = vmax.f32 %v131_v48, %v134_v50 }
  0xf1   :  { %533 = vmatmul.mubr.f32.vlgmr.msra.gmra.mrb[0].mxu1 %v135_v51 }
  0xf2   :  { %602 = vmatprep.mubr.msk.f32.mxu1 %vm736_vm0, %v735_v0  ;;  %655 = vmatpush3.bf16.msra.mxu1 %v654_v61  ;;  %v330_v0 = vld [vmem:[%s967_s7 + $0x20] sm:$0xff]  ;;  %s706_s7 = scalar_lea.vmem %s428_s23, 128 }
  0xf3   :  { %656 = vmatprep.subr.bf16.mxu1 %v737_v1  ;;  %v660_v3 = vpack.c.bf16 %v331_v2, %v330_v0  ;;  %p707_p8 = scmp.ne.s32.totalorder %s428_s23, %s706_s7  ;;  %p712_p10 = scmp.lt.s32.totalorder %s706_s7, %s706_s7 }
  0xf5   :  { %p713_p11 = por %p712_p10, %p711_p9 }
  0xf6   :  { %658 = vmatpush3.bf16.msra.mxu1 %v657_v63 }
  0xf7   :  { %659 = vmatprep.subr.bf16.mxu1 %v737_v1  ;;  %p714_p12 = pnand %p713_p11, %p707_p8 }
  0xfa   :  { %661 = vmatpush3.bf16.msra.mxu1 %v660_v3 }
  0xfb   :  { %662 = vmatprep.subr.bf16.mxu1 %v737_v1 }
  0xfe   :  { %664 = vmatpush3.bf16.msra.mxu1 %v663_v6 }
  0xff   :  { %665 = vmatprep.subr.bf16.mxu1 %v737_v1 }
 0x102   :  { %667 = vmatpush3.bf16.msra.mxu1 %v666_v9 }
 0x103   :  { %668 = vmatprep.subr.bf16.mxu1 %v737_v1 }
 0x106   :  { %670 = vmatpush3.bf16.msra.mxu1 %v669_v12 }
 0x107   :  { %671 = vmatprep.subr.bf16.mxu1 %v737_v1 }
 0x10a   :  { %673 = vmatpush3.bf16.msra.mxu1 %v672_v21 }
 0x10b   :  { %674 = vmatprep.subr.bf16.mxu1 %v737_v1  ;;  %v441_v1 = vld [vmem:[%s968_s8] ss:$0 sm:$0xff] }
 0x10e   :  { %676 = vmatpush3.bf16.msra.mxu1 %v675_v24 }
 0x1c4   :  { %v225_v14 = vpop.f32.mrb[0].mxu1 }
 0x1c5   :  { %v226_v15 = vadd.f32 %v439_v13, %v225_v14  ;;  %v534_v16 = vpop.f32.mrb[1].mxu1 }
 0x1c7   :  { %v229_v17 = vmul.f32 0.01, %v226_v15 }
 0x1c9   :  { %v230_v18 = vmax.f32 %v226_v15, %v229_v17 }
 0x1cb   :  { %568 = vmatmul.mubr.f32.vlgmr.msra.gmra.mrb[2].mxu0 %v230_v18 }
 0x29e   :  { %v320_v26 = vpop.f32.mrb[2].mxu0 }
 0x29f   :  { %v321_v27 = vadd.f32 %v440_v25, %v320_v26  ;;  %v569_v28 = vpop.f32.mrb[3].mxu0 }
 0x2a1   :  { %v324_v29 = vmul.f32 0.01, %v321_v27 }
 0x2a3   :  { %v325_v30 = vmax.f32 %v321_v27, %v324_v29 }
 0x2a5   :  { %603 = vmatmul.mubr.f32.vlgmr.msra.gmra.mrb[2].mxu1 %v325_v30 }
 0x378   :  { %v415_v31 = vpop.f32.mrb[2].mxu1 }
 0x379   :  { %v416_v32 = vadd.f32 %v441_v1, %v415_v31  ;;  %v604_v33 = vpop.f32.mrb[3].mxu1 }
 0x37b   :  { %420 = vst.msk [vmem:[#allocation5] sm:$0xff] %vm419_vm3, %v416_v32 }
 0x37c   :  { %717 = shalt.err (!%p714_p12)
}
 0x37d   :  { %s718_s5 = scalar_lea.hbm %s969_s9, 128 }
 0x37e   :  { %p719_p13 = scmp.ne.s32.totalorder %s969_s9, %s718_s5  ;;  %p722_p0 = scmp.lt.u32.totalorder %s718_s5, %s969_s9 }
 0x380   :  { %p724_p1 = pnand %p722_p0, %p719_p13 }
 0x382   :  { %727 = shalt.err (!%p724_p1)
}
 0x383   :  { %430 = dma.vmem_to_hbm [thread:$0]  %s428_s23, 128, %s969_s9, [#allocation4]  }
 0x384   :  { %730 = dma.done.wait [#allocation4], 128  }
 0x385   :  { %731 = vsyncadd [#allocation4], 4294967168 }
 0x386   :  { %434 = vsyncpa [#allocation3], 1 }
 0x387   :  { %435 = vsyncpa [#allocation4], 1 }

</bundles_post_ra>
